<compile_context>
chip_gen: v5e
topology: v5e:2x2
jax: 0.10.0
libtpu: 0.0.40
codegen_flags: <defaults>
</compile_context>

<pallas_src>
import numpy as np

import jax
import jax.numpy as jnp
from jax.experimental import pallas as pl
from jax.experimental.pallas import tpu as pltpu


# ---------------------------------------------------------------------------
# Kernels
# ---------------------------------------------------------------------------
def _residual_kernel_full_n(x_ref, w_ref, b_ref, o_ref):
    """Path A: N/K un-tiled (tn == N, tk == K).  One MXU pass, no accumulator.

    x_ref: (tm, K), w_ref: (K, N), b_ref: (1, N), o_ref: (tm, N).  Since the
    weight is square (N == K), the residual tile is exactly the matmul x tile,
    so x is read from HBM only once.
    """
    acc = jnp.dot(x_ref[...], w_ref[...], preferred_element_type=jnp.float32)
    acc += x_ref[...].astype(jnp.float32) + b_ref[...].astype(jnp.float32)
    o_ref[...] = acc.astype(o_ref.dtype)


def _residual_kernel_tiled(x_ref, w_ref, b_ref, o_ref, acc_ref):
    """Path B: (M, N, K) grid with tn == tk and an f32 VMEM accumulator.

    The inner loop is a pure MXU accumulate.  The residual is added at the
    k == j step, where the x matmul tile coincides with the output tile
    (square weight, N == K) — no duplicated x input, no extra HBM read.
    Bias is added once in the last-K epilogue.
    """
    j = pl.program_id(1)
    k = pl.program_id(2)

    @pl.when(k == 0)
    def _():
        acc_ref[...] = jnp.zeros_like(acc_ref)

    acc_ref[...] += jnp.dot(
        x_ref[...], w_ref[...], preferred_element_type=jnp.float32
    )

    @pl.when(k == j)
    def _():
        acc_ref[...] += x_ref[...].astype(jnp.float32)

    @pl.when(k == pl.num_programs(2) - 1)
    def _():
        o_ref[...] = (
            acc_ref[...] + b_ref[...].astype(jnp.float32)
        ).astype(o_ref.dtype)


# ---------------------------------------------------------------------------
# Tile selection
# ---------------------------------------------------------------------------
def _divisor_tile_le(dim, cap, align):
    """Largest t <= cap with dim % t == 0 and t % align == 0 (None if none)."""
    t = min(cap, dim)
    t -= t % align
    while t >= align:
        if dim % t == 0:
            return t
        t -= align
    return None


def _choose_tiles(M, N, K, in_bytes, out_bytes, vmem_budget):
    """Return (tm, tn, tk, full_n).  full_n=True selects Path A (N/K un-tiled)."""

    def cost(tm, tn, tk, with_acc):
        # Double-buffered input/output pipelines (+ optional f32 acc scratch).
        c = 2 * (tm * tk + tk * tn + tn) * in_bytes + 2 * tm * tn * out_bytes
        if with_acc:
            c += tm * tn * 4
        return c

    # Path A: keep the whole H on-chip per row block (no reduction axis).
    tm = _divisor_tile_le(M, 1024, 8) or M
    t = tm
    while t is not None:
        if cost(t, N, K, False) <= vmem_budget:
            return t, N, K, True
        t = _divisor_tile_le(M, t // 2, 8)

    # Path B: tile N and K with tn == tk so the k == j residual trick applies.
    # Keep tm as large as possible (amortizes W re-reads); shrink tn first.
    tn = _divisor_tile_le(N, 512, 128) or N
    for _ in range(64):
        if cost(tm, tn, tn, True) <= vmem_budget:
            break
        new_tn = _divisor_tile_le(N, tn // 2, 128) if tn > 128 else None
        if new_tn is not None and new_tn < tn:
            tn = new_tn
            continue
        new_tm = _divisor_tile_le(M, tm // 2, 8) if tm > 8 else None
        if new_tm is not None and new_tm < tm:
            tm = new_tm
            continue
        break
    return tm, tn, tn, False


# ---------------------------------------------------------------------------
# Wrapper
# ---------------------------------------------------------------------------
def residual_linear(x, w, b, *, compute_dtype=None, out_dtype=None,
                    vmem_budget_bytes=48 * 1024 * 1024):
    """(x @ w + b) + x fused into a single Pallas TPU kernel.

    x: [..., H], w: [H, H] (stored [in, out]), b: [H] or [1, H].
    compute_dtype: optional cast applied to x/W before the MXU (pass
    jnp.bfloat16 for full-rate MXU on v5e/v6e/v7x); accumulation is f32.
    """
    orig_dtype = x.dtype
    if out_dtype is None:
        out_dtype = orig_dtype

    lead = x.shape[:-1]
    K = x.shape[-1]
    Kw, N = w.shape
    assert K == Kw and N == K, "Residual requires fn: H -> H (square weight)"

    x2 = x.reshape(-1, K)
    M = x2.shape[0]
    b2 = jnp.asarray(b).reshape(1, N)

    if compute_dtype is not None:
        x2 = x2.astype(compute_dtype)
        w = w.astype(compute_dtype)

    in_bytes = x2.dtype.itemsize
    out_bytes = np.dtype(out_dtype).itemsize

    tm, tn, tk, full_n = _choose_tiles(
        M, N, K, in_bytes, out_bytes, vmem_budget_bytes
    )

    cost = pl.CostEstimate(
        flops=2 * M * N * K + 2 * M * N,
        transcendentals=0,
        bytes_accessed=(M * K + K * N + N) * in_bytes + M * N * out_bytes,
    )
    # 64 MiB scoped VMEM is within physical limits on every generation
    # (v5e/v6e: 128 MiB, v7x: 64 MiB per TensorCore).
    vmem_limit = 64 * 1024 * 1024

    if full_n:
        out2 = pl.pallas_call(
            _residual_kernel_full_n,
            out_shape=jax.ShapeDtypeStruct((M, N), out_dtype),
            grid=(M // tm,),
            in_specs=[
                pl.BlockSpec((tm, K), lambda i: (i, 0)),   # x row block
                pl.BlockSpec((K, N), lambda i: (0, 0)),    # full weight
                pl.BlockSpec((1, N), lambda i: (0, 0)),    # bias
            ],
            out_specs=pl.BlockSpec((tm, N), lambda i: (i, 0)),
            compiler_params=pltpu.CompilerParams(
                dimension_semantics=("parallel",),
                vmem_limit_bytes=vmem_limit,
            ),
            cost_estimate=cost,
        )(x2, w, b2)
    else:
        out2 = pl.pallas_call(
            _residual_kernel_tiled,
            out_shape=jax.ShapeDtypeStruct((M, N), out_dtype),
            grid=(M // tm, N // tn, K // tk),
            in_specs=[
                # x matmul tile: varies along K (also supplies the residual
                # at the k == j step — no duplicated x input).
                pl.BlockSpec((tm, tk), lambda i, j, k: (i, k)),
                # Weight tile: varies along K and N.
                pl.BlockSpec((tk, tn), lambda i, j, k: (k, j)),
                # Bias tile: constant over i and k.
                pl.BlockSpec((1, tn), lambda i, j, k: (0, j)),
            ],
            out_specs=pl.BlockSpec((tm, tn), lambda i, j, k: (i, j)),
            scratch_shapes=[pltpu.VMEM((tm, tn), jnp.float32)],
            compiler_params=pltpu.CompilerParams(
                dimension_semantics=("parallel", "parallel", "arbitrary"),
                vmem_limit_bytes=vmem_limit,
            ),
            cost_estimate=cost,
        )(x2, w, b2)

    return out2.reshape(*lead, N)


class Residual:
    """JAX mirror of the PyTorch Residual wrapper: forward(x) = fn(x) + x."""

    def __init__(self, fn):
        self.fn = fn

    def __call__(self, x, *args, **kwargs):
        return self.fn(x, *args, **kwargs) + x


if __name__ == "__main__":
    key = jax.random.PRNGKey(0)
    batch, seq, hidden = 2, 8, 32

    k_x, k_w, k_b = jax.random.split(key, 3)
    x = jax.random.normal(k_x, (batch, seq, hidden), dtype=jnp.float32)
    # Deterministic synthetic "Linear" parameters (W stored [in, out]).
    w = jax.random.normal(k_w, (hidden, hidden), dtype=jnp.float32) * 0.02
    b = jax.random.normal(k_b, (hidden,), dtype=jnp.float32) * 0.02

    # Pallas-fused Residual(Linear): fn(x) + x in one kernel (f32 path).
    out = residual_linear(x, w, b)
    jax.block_until_ready(out)

    # Reference: the generic Residual wrapper around a plain-JAX linear.
    ref = Residual(lambda z: z @ w + b)(x)
    assert jnp.allclose(out, ref, atol=1e-5, rtol=1e-5), "f32 mismatch vs ref"

    # bf16 MXU fast path (f32 accumulation inside the kernel).
    out_bf16 = residual_linear(x, w, b, compute_dtype=jnp.bfloat16)
    jax.block_until_ready(out_bf16)
    assert jnp.allclose(out_bf16, ref, atol=1e-1, rtol=1e-1), "bf16 mismatch vs ref"

    print("KERNEL_OK")
</pallas_src>

<mosaic_0001>
module attributes {stable_mosaic.version = 11 : i64} {
  func.func @_residual_kernel_full_n(%arg0: i32, %arg1: memref<16x32xf32, #tpu.memory_space<vmem>>, %arg2: memref<32x32xf32, #tpu.memory_space<vmem>>, %arg3: memref<1x32xf32, #tpu.memory_space<vmem>>, %arg4: memref<16x32xf32, #tpu.memory_space<vmem>>) attributes {dimension_semantics = [#tpu.dimension_semantics<parallel>], iteration_bounds = array<i64: 1>, scalar_prefetch = 0 : i64, scratch_operands = 0 : i64, tpu.core_type = #tpu.core_type<tc>, window_params = [{transform_indices = @transform_0, window_bounds = array<i64: 16, 32>}, {pipeline_mode = #tpu.pipeline_mode<synchronous>, transform_indices = @transform_1, window_bounds = array<i64: 32, 32>}, {pipeline_mode = #tpu.pipeline_mode<synchronous>, transform_indices = @transform_2, window_bounds = array<i64: 1, 32>}, {transform_indices = @transform_3, window_bounds = array<i64: 16, 32>}]} {
    %c0 = arith.constant 0 : index
    %c0_0 = arith.constant 0 : index
    %0 = vector.load %arg1[%c0, %c0_0] : memref<16x32xf32, #tpu.memory_space<vmem>>, vector<16x32xf32>
    %c0_1 = arith.constant 0 : index
    %c0_2 = arith.constant 0 : index
    %1 = vector.load %arg2[%c0_1, %c0_2] : memref<32x32xf32, #tpu.memory_space<vmem>>, vector<32x32xf32>
    %cst = arith.constant dense<0.000000e+00> : vector<16x32xf32>
    %2 = tpu.matmul %0, %1, %cst {dimension_numbers = #tpu.dot_dimension_numbers<[1], [0], [0], [1], [0, 0, 1, 1], [], []>} : vector<16x32xf32>, vector<32x32xf32>, vector<16x32xf32> -> vector<16x32xf32>
    %c0_3 = arith.constant 0 : index
    %c0_4 = arith.constant 0 : index
    %3 = vector.load %arg1[%c0_3, %c0_4] : memref<16x32xf32, #tpu.memory_space<vmem>>, vector<16x32xf32>
    %c0_5 = arith.constant 0 : index
    %c0_6 = arith.constant 0 : index
    %4 = vector.load %arg3[%c0_5, %c0_6] : memref<1x32xf32, #tpu.memory_space<vmem>>, vector<1x32xf32>
    %5 = vector.broadcast %4 : vector<1x32xf32> to vector<16x32xf32>
    %6 = arith.addf %3, %5 : vector<16x32xf32>
    %7 = arith.addf %2, %6 : vector<16x32xf32>
    %c0_7 = arith.constant 0 : index
    %c0_8 = arith.constant 0 : index
    %8 = vector.load %arg4[%c0_7, %c0_8] : memref<16x32xf32, #tpu.memory_space<vmem>>, vector<16x32xf32>
    tpu.vector_store %arg4[%c0_7, %c0_8], %7 {strides = array<i32>} : memref<16x32xf32, #tpu.memory_space<vmem>>, vector<16x32xf32>,
    return
  }
  func.func @transform_0(%arg0: i32) -> (i32, i32) {
    %c0_i32 = arith.constant 0 : i32
    %c0_i32_0 = arith.constant 0 : i32
    return %arg0, %c0_i32 : i32, i32
  }
  func.func @transform_1(%arg0: i32) -> (i32, i32) {
    %c0_i32 = arith.constant 0 : i32
    %c0_i32_0 = arith.constant 0 : i32
    %c0_i32_1 = arith.constant 0 : i32
    return %c0_i32, %c0_i32_0 : i32, i32
  }
  func.func @transform_2(%arg0: i32) -> (i32, i32) {
    %c0_i32 = arith.constant 0 : i32
    %c0_i32_0 = arith.constant 0 : i32
    %c0_i32_1 = arith.constant 0 : i32
    return %c0_i32, %c0_i32_0 : i32, i32
  }
  func.func @transform_3(%arg0: i32) -> (i32, i32) {
    %c0_i32 = arith.constant 0 : i32
    %c0_i32_0 = arith.constant 0 : i32
    return %arg0, %c0_i32 : i32, i32
  }
}

</mosaic_0001>

<bundles_post_ra>
// kernel: tpu_custom_call.1
= control target key start
LH: loop header
LB: loop body
LE: loop exit
PB: predicated region body
PF: predicated region fallthrough
CT: control target
= control target key end

     0   :  { %8 = vsyncpa [#allocation3], 0  ;;  %s251_s0 = inlined_call_operand.hbm [shape: f32[16,32], index: 0, kind: input, shape index: {}]   ;;  %s252_s1 = inlined_call_operand.hbm [shape: f32[32,32], index: 1, kind: input, shape index: {}]   ;;  %s253_s2 = inlined_call_operand.vmem [shape: f32[1,32], index: 2, kind: input, shape index: {}]   ;;  %s254_s3 = inlined_call_operand.hbm [shape: f32[16,32], index: 3, kind: output, shape index: {}]  }
   0x1   :  { %9 = vsyncpa [#allocation6], 0 }
   0x2   :  { %10 = vsyncpa [#allocation4], 0  ;;  %s15_s14 = sshll.u32 %s251_s0, 4  ;;  %s201_s15 = smov [#allocation2]   ;;  %s16_s14 = int_to_ptr.hbm [resolvable:$true] %s15_s14 }
   0x3   :  { %s17_s16 = sshll.u32 %s201_s15, 4  ;;  %s28_s19 = sshll.u32 %s252_s1, 4  ;;  %s18_s16 = int_to_ptr.vmem [resolvable:$true] %s17_s16  ;;  %s29_s19 = int_to_ptr.hbm [resolvable:$true] %s28_s19 }
   0x4   :  { %s202_s20 = smov 128   ;;  %s203_s21 = smov 8  }
   0x5   :  { %23 = dma.hbm_to_vmem [thread:$0]  %s16_s14, 256, %s18_s16, [#allocation3], %s202_s20, %s202_s20, %s203_s21  }
   0x6   :  { %s204_s22 = smov [#allocation5]  }
   0x7   :  { %s30_s23 = sshll.u32 %s204_s22, 4  ;;  %s31_s23 = int_to_ptr.vmem [resolvable:$true] %s30_s23 }
   0x8   :  { %36 = dma.hbm_to_vmem [thread:$0]  %s29_s19, 512, %s31_s23, [#allocation6], %s202_s20, %s202_s20, %s203_s21  }
   0x9   :  { %195 = dma.done.wait [#allocation3], 256  }
   0xa   :  { %196 = vsyncadd [#allocation3], 4294967040 }
   0xb   :  { %197 = dma.done.wait [#allocation6], 512  }
   0xc   :  { %198 = vsyncadd [#allocation6], 4294966784  ;;  %v52_v0 = vld [vmem:[#allocation5 + $0x18] sm:$0xff]  ;;  %v51_v1 = vld [vmem:[#allocation5 + $0x10] sm:$0xff]  ;;  %vm59_vm0 = vcmask 261120   ;;  %s205_s24 = smov [#allocation7]  }
   0xd   :  { %78 = vmatpush.msra.mxu0 %v52_v0  ;;  %113 = vmatpush.msra.mxu1 %v52_v0  ;;  %v50_v2 = vld [vmem:[#allocation5 + $0x8] sm:$0xff]  ;;  %v49_v3 = vld [vmem:[#allocation5] sm:$0xff]  ;;  %v47_v4 = vld [vmem:[#allocation2] sm:$0xff]  ;;  %s95_s25 = sshll.u32 %s205_s24, 4  ;;  %s97_s28 = sshll.u32 %s254_s3, 4  ;;  %s96_s25 = int_to_ptr.vmem [resolvable:$true] %s95_s25  ;;  %s98_s28 = int_to_ptr.hbm [resolvable:$true] %s97_s28 }
   0xe   :  { %v48_v5 = vld [vmem:[#allocation2 + $0x8] sm:$0xff]  ;;  %v122_v6 = vld [vmem:[%s253_s2] ss:$0 sm:$0xff] }
   0xf   :  { %79 = vmatpush.msra.mxu0 %v51_v1  ;;  %114 = vmatpush.msra.mxu1 %v51_v1  ;;  %v57_v7 = vadd.f32 %v122_v6, %v47_v4  ;;  %v58_v8 = vadd.f32 %v122_v6, %v48_v5 }
  0x11   :  { %80 = vmatpush.msra.mxu0 %v50_v2  ;;  %115 = vmatpush.msra.mxu1 %v50_v2 }
  0x13   :  { %81 = vmatpush.msra.mxu0 %v49_v3  ;;  %116 = vmatpush.msra.mxu1 %v49_v3 }
  0x14   :  { %111 = vmatmul.msk.f32.vlgmr.msra.gmra.mxu0 %vm59_vm0, %v47_v4  ;;  %112 = vmatmul.msk.f32.vlgmr.msra.gmra.mxu1 %vm59_vm0, %v48_v5 }
  0x91   :  { %v83_v9 = vpop.f32.mrf.mxu0  ;;  %v86_v10 = vpop.f32.mrf.mxu1 }
  0x92   :  { %v84_v11 = vadd.f32 %v83_v9, %v57_v7  ;;  %v87_v12 = vadd.f32 %v86_v10, %v58_v8 }
  0x94   :  { %89 = vst.msk [vmem:[#allocation7] sm:$0xff] %vm59_vm0, %v84_v11 }
  0x95   :  { %90 = vst.msk [vmem:[#allocation7 + $0x8] sm:$0xff] %vm59_vm0, %v87_v12 }
  0x96   :  { %103 = dma.vmem_to_hbm [thread:$0]  %s96_s25, 256, %s98_s28, [#allocation4], %s202_s20, %s202_s20, %s203_s21  }
  0x97   :  { %199 = dma.done.wait [#allocation4], 256  }
  0x98   :  { %200 = vsyncadd [#allocation4], 4294967040 }
  0x99   :  { %108 = vsyncpa [#allocation3], 1 }
  0x9a   :  { %109 = vsyncpa [#allocation6], 1 }
  0x9b   :  { %110 = vsyncpa [#allocation4], 1 }

</bundles_post_ra>
